<compile_context>
chip_gen: v5e
topology: v5e:2x2
jax: 0.10.0
libtpu: 0.0.40
codegen_flags: <defaults>
</compile_context>

<pallas_src>
import jax
import jax.numpy as jnp
from jax import lax
from jax.experimental import pallas as pl
from jax.experimental.pallas import tpu as pltpu


# ----------------------------------------------------------------------------
# Tiling helper
# ----------------------------------------------------------------------------
def _batch_tile(B: int) -> int:
    """Batch-row tile: full batch for small B, otherwise a multiple of 8,
    capped at 512 rows and <= B/2 once B >= 16 (>= 2 blocks -> v7x megacore)."""
    if B < 16:
        return B                       # single block == full extent (always legal)
    tb = (B // 2) // 8 * 8
    return max(8, min(512, tb))


# ----------------------------------------------------------------------------
# Pallas kernel 1: fused drift+diffusion 2-layer MLP (eager f/g path)
#   out = tanh(x @ W1cat + b1cat) @ W2blk + b2cat       out is (TB, 128) = [f|g|0]
# ----------------------------------------------------------------------------
def _fused_fg_kernel(x_ref, w1_ref, b1_ref, w2_ref, b2_ref, o_ref):
    x16 = x_ref[...].astype(jnp.bfloat16)                            # (TB, D)
    h = jnp.dot(x16, w1_ref[...], preferred_element_type=jnp.float32)
    h = jnp.tanh(h + b1_ref[...])                                    # f32 (TB, 128)
    o = jnp.dot(h.astype(jnp.bfloat16), w2_ref[...],
                preferred_element_type=jnp.float32)
    o_ref[...] = (o + b2_ref[...]).astype(o_ref.dtype)               # lane-dense store


def _fused_fg_pallas(x, w1, b1, w2, b2):
    B, D = x.shape
    W = w2.shape[1]                    # 128 (lane-dense fused output width)
    tb = _batch_tile(B)
    nb = pl.cdiv(B, tb)
    cost = pl.CostEstimate(
        flops=2 * B * (D * W + W * W),
        transcendentals=B * W,
        bytes_accessed=4 * (x.size + B * W) + 2 * (w1.size + w2.size)
        + 4 * (b1.size + b2.size),
    )
    return pl.pallas_call(
        _fused_fg_kernel,
        out_shape=jax.ShapeDtypeStruct((B, W), jnp.float32),
        grid=(nb,),
        in_specs=[
            pl.BlockSpec((tb, D), lambda i: (i, 0)),     # x: tiled over batch
            pl.BlockSpec((D, W), lambda i: (0, 0)),      # weights: VMEM-resident
            pl.BlockSpec((1, W), lambda i: (0, 0)),
            pl.BlockSpec((W, W), lambda i: (0, 0)),
            pl.BlockSpec((1, W), lambda i: (0, 0)),
        ],
        out_specs=pl.BlockSpec((tb, W), lambda i: (i, 0)),
        compiler_params=pltpu.CompilerParams(
            dimension_semantics=("parallel",)),
        cost_estimate=cost,
    )(x, w1, b1, w2, b2)


_fused_fg_jit = jax.jit(_fused_fg_pallas)


# ----------------------------------------------------------------------------
# Pallas kernel 2: whole Euler–Maruyama trajectory in ONE pallas_call.
#   grid = (batch_blocks, n_steps); state carried in the VMEM-resident output
#   block across the inner "arbitrary" step axis; weights DMA'd once per block.
# ----------------------------------------------------------------------------
def _em_fused_kernel(dt_ref, x0_ref, dw_ref, w1_ref, b1_ref, w2_ref, b2_ref,
                     o_ref):
    s = pl.program_id(1)
    d = x0_ref.shape[1]

    # Initialize the carried state from x0 at the first solver step.
    @pl.when(s == 0)
    def _():
        o_ref[...] = x0_ref[...]

    x = o_ref[...]                                                   # (tb, D) f32 carry
    # bf16 MXU operands, f32 accumulation; bias / tanh / state update stay f32.
    h = jnp.dot(x.astype(jnp.bfloat16), w1_ref[...],
                preferred_element_type=jnp.float32)                  # (tb, 128)
    h = jnp.tanh(h + b1_ref[...])
    o = jnp.dot(h.astype(jnp.bfloat16), w2_ref[...],
                preferred_element_type=jnp.float32) + b2_ref[...]    # (tb,128)=[f|g|0]
    fx = o[:, :d]
    gx = o[:, d:2 * d]
    # Fused EM update; the padded slab never leaves VMEM, only (tb, D) state does.
    o_ref[...] = x + dt_ref[0] * fx + gx * dw_ref[0]


def _euler_maruyama_pallas(x0, dt, noise, w1, b1, w2, b2):
    B, D = x0.shape
    n_steps = noise.shape[0]
    W = w2.shape[1]                    # 128
    tb = _batch_tile(B)
    nb = pl.cdiv(B, tb)
    dt_arr = jnp.asarray(dt, jnp.float32).reshape(1)
    cost = pl.CostEstimate(
        flops=n_steps * B * (2 * D * W + 2 * W * W + 4 * D),
        transcendentals=n_steps * B * W,
        bytes_accessed=4 * (x0.size + B * D + noise.size)
        + 2 * (w1.size + w2.size) + 4 * (b1.size + b2.size),
    )
    return pl.pallas_call(
        _em_fused_kernel,
        out_shape=jax.ShapeDtypeStruct((B, D), jnp.float32),
        grid=(nb, n_steps),
        in_specs=[
            pl.BlockSpec(memory_space=pltpu.MemorySpace.SMEM),       # dt scalar
            pl.BlockSpec((tb, D), lambda b, s: (b, 0)),              # x0
            pl.BlockSpec((1, tb, D), lambda b, s: (s, b, 0)),        # dW per step
            pl.BlockSpec((D, W), lambda b, s: (0, 0)),               # w1 (resident)
            pl.BlockSpec((1, W), lambda b, s: (0, 0)),               # b1
            pl.BlockSpec((W, W), lambda b, s: (0, 0)),               # w2
            pl.BlockSpec((1, W), lambda b, s: (0, 0)),               # b2
        ],
        out_specs=pl.BlockSpec((tb, D), lambda b, s: (b, 0)),        # state carry
        compiler_params=pltpu.CompilerParams(
            dimension_semantics=("parallel", "arbitrary")),
        cost_estimate=cost,
    )(dt_arr, x0, noise, w1, b1, w2, b2)


euler_maruyama = jax.jit(_euler_maruyama_pallas)
# TODO(synk): in-kernel Brownian increments via pltpu.prng_seed/stateful_normal
# would remove the (n_steps, B, D) noise DMA entirely; kept host-side for
# deterministic comparison against the pure-JAX reference.


# ----------------------------------------------------------------------------
# Fused parameter container for the drift / diffusion MLP pair
#   each net: Linear(D, H) -> Tanh -> Linear(H, D)
# ----------------------------------------------------------------------------
class FusedDriftDiffusion:
    def __init__(self, key, d, h):
        assert 2 * h == 128, "fused hidden width must be 128 lanes"
        assert 2 * d <= 128, "fused (padded) output width is 128 lanes"
        ks = jax.random.split(key, 8)
        lim1 = 1.0 / float(d) ** 0.5
        lim2 = 1.0 / float(h) ** 0.5

        def u(k, shape, lim):
            return jax.random.uniform(k, shape, jnp.float32, -lim, lim)

        # PyTorch-Linear-like init, per network.
        w1_f, b1_f = u(ks[0], (d, h), lim1), u(ks[1], (1, h), lim1)
        w2_f, b2_f = u(ks[2], (h, d), lim2), u(ks[3], (1, d), lim2)
        w1_g, b1_g = u(ks[4], (d, h), lim1), u(ks[5], (1, h), lim1)
        w2_g, b2_g = u(ks[6], (h, d), lim2), u(ks[7], (1, d), lim2)

        self.d, self.h = d, h
        out_w = 128
        # First layer: concat along hidden axis -> (D, 128), bf16 MXU operand.
        self.w1 = jnp.concatenate([w1_f, w1_g], axis=1).astype(jnp.bfloat16)
        self.b1 = jnp.concatenate([b1_f, b1_g], axis=1)              # f32 (1, 128)
        # Second layer: block-diagonal + exact-zero lane padding -> (128, 128).
        w2 = jnp.zeros((2 * h, out_w), jnp.float32)
        w2 = w2.at[:h, :d].set(w2_f)
        w2 = w2.at[h:, d:2 * d].set(w2_g)
        self.w2 = w2.astype(jnp.bfloat16)
        b2 = jnp.zeros((1, out_w), jnp.float32)
        b2 = b2.at[:, :d].set(b2_f)
        b2 = b2.at[:, d:2 * d].set(b2_g)
        self.b2 = b2
        # Memoize the last fused evaluation (eager f() then g() at the same x
        # -> one kernel launch).
        self._cache_x = None
        self._cache_out = None
        # No `.t` attribute -> SDEFunc's `module.t = t` hook is a no-op,
        # exactly as for plain nn.Linear/nn.Tanh stacks in torch.

    def both(self, x):
        """One fused kernel launch -> (drift(x), diffusion(x)), memoized."""
        if self._cache_x is not x:
            self._cache_out = _fused_fg_jit(x, self.w1, self.b1, self.w2, self.b2)
            self._cache_x = x
        out = self._cache_out
        d = self.d
        return out[:, :d], out[:, d:2 * d]


class DriftFn:
    """Callable drift network (shares the fused parameter pair)."""
    def __init__(self, pair):
        self._pair = pair

    def __call__(self, x):
        return self._pair.both(x)[0]


class DiffusionFn:
    """Callable diffusion network (shares the fused parameter pair)."""
    def __init__(self, pair):
        self._pair = pair

    def __call__(self, x):
        return self._pair.both(x)[1]


# ----------------------------------------------------------------------------
# SDEFunc: faithful port of the torchdyn wrapper semantics
# ----------------------------------------------------------------------------
class SDEFunc:
    def __init__(self, f, g, order: int = 1):
        self.order, self.intloss, self.sensitivity = order, None, None
        self.f_func, self.g_func = f, g
        self.nfe = 0

    def forward(self, t, x):
        # Matches the reference: `forward` is `pass` (returns None).
        pass

    @staticmethod
    def _inject_t(func, t):
        # Mirror of `for _, module in func.named_modules(): if hasattr(module,'t')`.
        if hasattr(func, "t"):
            func.t = t

    def f(self, t, x):
        self.nfe += 1
        self._inject_t(self.f_func, t)
        return self.f_func(x)

    def g(self, t, x):
        self._inject_t(self.g_func, t)
        return self.g_func(x)

    # TPU fusion helper (extra, not in the torch API): one kernel launch gives
    # both drift and diffusion — what an SDE solver step actually needs.
    def f_and_g(self, t, x):
        self.nfe += 1
        self._inject_t(self.f_func, t)
        self._inject_t(self.g_func, t)
        pair = getattr(self.f_func, "_pair", None)
        if pair is not None and pair is getattr(self.g_func, "_pair", None):
            return pair.both(x)
        return self.f_func(x), self.g_func(x)


# ----------------------------------------------------------------------------
# Demo / smoke test
# ----------------------------------------------------------------------------
if __name__ == "__main__":
    B, D, H = 8, 32, 64  # batch, state dim, per-net hidden dim (fused hidden = 128)

    key = jax.random.PRNGKey(0)
    kx, kp, kn = jax.random.split(key, 3)

    x = jax.random.normal(kx, (B, D), jnp.float32)
    t = jnp.float32(0.0)

    pair = FusedDriftDiffusion(kp, D, H)
    sde = SDEFunc(f=DriftFn(pair), g=DiffusionFn(pair), order=1)

    # forward() is a no-op, as in the reference module.
    assert sde.forward(t, x) is None

    fx = sde.f(t, x)                 # drift     (fused Pallas kernel)
    gx = sde.g(t, x)                 # diffusion (memoized -> no second launch)
    fx2, gx2 = sde.f_and_g(t, x)     # both, same cached launch
    jax.block_until_ready((fx, gx, fx2, gx2))

    # Pure-JAX f32 reference (bf16-stored weights upcast); only deviation is
    # the kernel's bf16 activation cast for the MXU.
    w1f32 = pair.w1.astype(jnp.float32)
    w2f32 = pair.w2.astype(jnp.float32)
    ref_out = jnp.tanh(x @ w1f32 + pair.b1) @ w2f32 + pair.b2
    ref_f, ref_g = ref_out[:, :D], ref_out[:, D:2 * D]

    assert fx.shape == (B, D) and gx.shape == (B, D)
    assert jnp.allclose(fx, ref_f, atol=2e-2, rtol=2e-2)
    assert jnp.allclose(gx, ref_g, atol=2e-2, rtol=2e-2)
    assert jnp.allclose(fx2, fx) and jnp.allclose(gx2, gx)
    assert sde.nfe == 2  # f() and f_and_g() each count one drift evaluation

    # Whole Euler–Maruyama trajectory: ONE fused pallas_call, weights resident,
    # state carried in VMEM, per-step noise streamed via BlockSpec.
    n_steps = 16
    dt = jnp.float32(0.01)
    noise = jax.random.normal(kn, (n_steps, B, D), jnp.float32) * jnp.sqrt(dt)
    xT = euler_maruyama(x, dt, noise, pair.w1, pair.b1, pair.w2, pair.b2)

    # Reference trajectory with matching bf16 activation casts (pure JAX).
    def ref_step(xc, dw):
        h = jnp.tanh(jnp.dot(xc.astype(jnp.bfloat16), pair.w1,
                             preferred_element_type=jnp.float32) + pair.b1)
        o = jnp.dot(h.astype(jnp.bfloat16), pair.w2,
                    preferred_element_type=jnp.float32) + pair.b2
        return xc + dt * o[:, :D] + o[:, D:2 * D] * dw, None

    xT_ref, _ = lax.scan(ref_step, x, noise)
    jax.block_until_ready((xT, xT_ref))

    assert xT.shape == (B, D) and bool(jnp.all(jnp.isfinite(xT)))
    assert jnp.allclose(xT, xT_ref, atol=2e-2, rtol=2e-2)

    print("KERNEL_OK")
</pallas_src>

<mosaic_0001>
module attributes {stable_mosaic.version = 11 : i64} {
  func.func @_fused_fg_kernel(%arg0: i32, %arg1: memref<8x32xf32, #tpu.memory_space<vmem>>, %arg2: memref<32x128xbf16, #tpu.memory_space<vmem>>, %arg3: memref<1x128xf32, #tpu.memory_space<vmem>>, %arg4: memref<128x128xbf16, #tpu.memory_space<vmem>>, %arg5: memref<1x128xf32, #tpu.memory_space<vmem>>, %arg6: memref<8x128xf32, #tpu.memory_space<vmem>>) attributes {dimension_semantics = [#tpu.dimension_semantics<parallel>], iteration_bounds = array<i64: 1>, scalar_prefetch = 0 : i64, scratch_operands = 0 : i64, tpu.core_type = #tpu.core_type<tc>, window_params = [{transform_indices = @transform_0, window_bounds = array<i64: 8, 32>}, {pipeline_mode = #tpu.pipeline_mode<synchronous>, transform_indices = @transform_1, window_bounds = array<i64: 32, 128>}, {pipeline_mode = #tpu.pipeline_mode<synchronous>, transform_indices = @transform_2, window_bounds = array<i64: 1, 128>}, {pipeline_mode = #tpu.pipeline_mode<synchronous>, transform_indices = @transform_3, window_bounds = array<i64: 128, 128>}, {pipeline_mode = #tpu.pipeline_mode<synchronous>, transform_indices = @transform_4, window_bounds = array<i64: 1, 128>}, {transform_indices = @transform_5, window_bounds = array<i64: 8, 128>}]} {
    %c0 = arith.constant 0 : index
    %c0_0 = arith.constant 0 : index
    %0 = vector.load %arg1[%c0, %c0_0] : memref<8x32xf32, #tpu.memory_space<vmem>>, vector<8x32xf32>
    %1 = arith.truncf %0 : vector<8x32xf32> to vector<8x32xbf16>
    %c0_1 = arith.constant 0 : index
    %c0_2 = arith.constant 0 : index
    %2 = vector.load %arg2[%c0_1, %c0_2] : memref<32x128xbf16, #tpu.memory_space<vmem>>, vector<32x128xbf16>
    %cst = arith.constant dense<0.000000e+00> : vector<8x128xf32>
    %3 = tpu.matmul %1, %2, %cst {dimension_numbers = #tpu.dot_dimension_numbers<[1], [0], [0], [1], [0, 0, 1, 1], [], []>} : vector<8x32xbf16>, vector<32x128xbf16>, vector<8x128xf32> -> vector<8x128xf32>
    %c0_3 = arith.constant 0 : index
    %c0_4 = arith.constant 0 : index
    %4 = vector.load %arg3[%c0_3, %c0_4] : memref<1x128xf32, #tpu.memory_space<vmem>>, vector<1x128xf32>
    %5 = vector.broadcast %4 : vector<1x128xf32> to vector<8x128xf32>
    %6 = arith.addf %3, %5 : vector<8x128xf32>
    %7 = math.tanh %6 : vector<8x128xf32>
    %8 = arith.truncf %7 : vector<8x128xf32> to vector<8x128xbf16>
    %c0_5 = arith.constant 0 : index
    %c0_6 = arith.constant 0 : index
    %9 = vector.load %arg4[%c0_5, %c0_6] : memref<128x128xbf16, #tpu.memory_space<vmem>>, vector<128x128xbf16>
    %cst_7 = arith.constant dense<0.000000e+00> : vector<8x128xf32>
    %10 = tpu.matmul %8, %9, %cst_7 {dimension_numbers = #tpu.dot_dimension_numbers<[1], [0], [0], [1], [0, 0, 1, 1], [], []>} : vector<8x128xbf16>, vector<128x128xbf16>, vector<8x128xf32> -> vector<8x128xf32>
    %c0_8 = arith.constant 0 : index
    %c0_9 = arith.constant 0 : index
    %11 = vector.load %arg5[%c0_8, %c0_9] : memref<1x128xf32, #tpu.memory_space<vmem>>, vector<1x128xf32>
    %12 = vector.broadcast %11 : vector<1x128xf32> to vector<8x128xf32>
    %13 = arith.addf %10, %12 : vector<8x128xf32>
    %c0_10 = arith.constant 0 : index
    %c0_11 = arith.constant 0 : index
    %14 = vector.load %arg6[%c0_10, %c0_11] : memref<8x128xf32, #tpu.memory_space<vmem>>, vector<8x128xf32>
    tpu.vector_store %arg6[%c0_10, %c0_11], %13 {strides = array<i32>} : memref<8x128xf32, #tpu.memory_space<vmem>>, vector<8x128xf32>,
    return
  }
  func.func @transform_0(%arg0: i32) -> (i32, i32) {
    %c0_i32 = arith.constant 0 : i32
    %c0_i32_0 = arith.constant 0 : i32
    return %arg0, %c0_i32 : i32, i32
  }
  func.func @transform_1(%arg0: i32) -> (i32, i32) {
    %c0_i32 = arith.constant 0 : i32
    %c0_i32_0 = arith.constant 0 : i32
    %c0_i32_1 = arith.constant 0 : i32
    return %c0_i32, %c0_i32_0 : i32, i32
  }
  func.func @transform_2(%arg0: i32) -> (i32, i32) {
    %c0_i32 = arith.constant 0 : i32
    %c0_i32_0 = arith.constant 0 : i32
    %c0_i32_1 = arith.constant 0 : i32
    return %c0_i32, %c0_i32_0 : i32, i32
  }
  func.func @transform_3(%arg0: i32) -> (i32, i32) {
    %c0_i32 = arith.constant 0 : i32
    %c0_i32_0 = arith.constant 0 : i32
    %c0_i32_1 = arith.constant 0 : i32
    return %c0_i32, %c0_i32_0 : i32, i32
  }
  func.func @transform_4(%arg0: i32) -> (i32, i32) {
    %c0_i32 = arith.constant 0 : i32
    %c0_i32_0 = arith.constant 0 : i32
    %c0_i32_1 = arith.constant 0 : i32
    return %c0_i32, %c0_i32_0 : i32, i32
  }
  func.func @transform_5(%arg0: i32) -> (i32, i32) {
    %c0_i32 = arith.constant 0 : i32
    %c0_i32_0 = arith.constant 0 : i32
    return %arg0, %c0_i32 : i32, i32
  }
}

</mosaic_0001>

<bundles_post_ra>
// kernel: _fused_fg_pallas.1
= control target key start
LH: loop header
LB: loop body
LE: loop exit
PB: predicated region body
PF: predicated region fallthrough
CT: control target
= control target key end

     0   :  { %10 = vsyncpa [#allocation3], 0  ;;  %s425_s0 = inlined_call_operand.hbm [shape: f32[8,32], index: 0, kind: input, shape index: {}]   ;;  %s426_s1 = inlined_call_operand.hbm [shape: bf16[32,128], index: 1, kind: input, shape index: {}]   ;;  %s427_s2 = inlined_call_operand.vmem [shape: f32[1,128], index: 2, kind: input, shape index: {}]   ;;  %s428_s3 = inlined_call_operand.hbm [shape: bf16[128,128], index: 3, kind: input, shape index: {}]   ;;  %s429_s4 = inlined_call_operand.vmem [shape: f32[1,128], index: 4, kind: input, shape index: {}]   ;;  %s430_s5 = inlined_call_operand.hbm [shape: f32[8,128], index: 5, kind: output, shape index: {}]  }
   0x1   :  { %11 = vsyncpa [#allocation6], 0  ;;  %s28_s20 = sshll.u32 %s426_s1, 4  ;;  %s29_s20 = int_to_ptr.hbm [resolvable:$true] %s28_s20 }
   0x2   :  { %12 = vsyncpa [#allocation4], 0  ;;  %s371_s21 = smov [#allocation5]   ;;  %s18_s25 = sshll.u32 %s425_s0, 4  ;;  %s19_s25 = int_to_ptr.hbm [resolvable:$true] %s18_s25 }
   0x3   :  { %s30_s22 = sshll.u32 %s371_s21, 4  ;;  %s372_s26 = smov 64   ;;  %s31_s22 = int_to_ptr.vmem [resolvable:$true] %s30_s22 }
   0x4   :  { %s373_s27 = smov 4   ;;  %s374_s28 = smov [#allocation2]  }
   0x5   :  { %36 = dma.hbm_to_vmem [thread:$0]  %s29_s20, 256, %s31_s22, [#allocation6], %s372_s26, %s372_s26, %s373_s27  }
   0x6   :  { %s20_s29 = sshll.u32 %s374_s28, 4  ;;  %s43_s7 = sshll.u32 %s428_s3, 4  ;;  %s21_s29 = int_to_ptr.vmem [resolvable:$true] %s20_s29  ;;  %s44_s7 = int_to_ptr.hbm [resolvable:$true] %s43_s7 }
   0x7   :  { %23 = dma.hbm_to_vmem [thread:$0]  %s19_s25, 128, %s21_s29, [#allocation3]  }
   0x8   :  { %s375_s1 = smov [#allocation7]  }
   0x9   :  { %s45_s8 = sshll.u32 %s375_s1, 4  ;;  %s46_s8 = int_to_ptr.vmem [resolvable:$true] %s45_s8 }
   0xa   :  { %51 = dma.hbm_to_vmem [thread:$0]  %s44_s7, 1024, %s46_s8, [#allocation6], %s372_s26, %s372_s26, %s373_s27  }
   0xb   :  { %365 = dma.done.wait [#allocation3], 128  }
   0xc   :  { %366 = vsyncadd [#allocation3], 4294967168 }
   0xd   :  { %367 = dma.done.wait [#allocation6], 1280  }
   0xe   :  { %368 = vsyncadd [#allocation6], 4294966016  ;;  %v250_v0 = vld [vmem:[#allocation5 + $0x8] sm:$0xff]  ;;  %v249_v2 = vld [vmem:[#allocation5] sm:$0xff]  ;;  %vm89_vm0 = vcmask 261120   ;;  %s376_s11 = smov [#allocation8]  }
   0xf   :  { %v258_v1 = vld [vmem:[#allocation7 + $0x38] sm:$0xff]  ;;  %99 = vmatpush.bf16.msra.mxu0 %v250_v0  ;;  %v67_v3 = vld [vmem:[#allocation2] sm:$0xff]  ;;  %v257_v4 = vld [vmem:[#allocation7 + $0x30] sm:$0xff]  ;;  %s195_s12 = sshll.u32 %s376_s11, 4  ;;  %s197_s15 = sshll.u32 %s430_s5, 4  ;;  %s196_s12 = int_to_ptr.vmem [resolvable:$true] %s195_s12  ;;  %s198_s15 = int_to_ptr.hbm [resolvable:$true] %s197_s15 }
  0x10   :  { %176 = vmatpush.bf16.msra.mxu1 %v258_v1  ;;  %v68_v5 = vpack.c.bf16 %v67_v3, %v67_v3  ;;  %v256_v6 = vld [vmem:[#allocation7 + $0x28] sm:$0xff]  ;;  %v255_v7 = vld [vmem:[#allocation7 + $0x20] sm:$0xff]  ;;  %v254_v8 = vld [vmem:[#allocation7 + $0x18] sm:$0xff] }
  0x11   :  { %v253_v9 = vld [vmem:[#allocation7 + $0x10] sm:$0xff]  ;;  %v252_v10 = vld [vmem:[#allocation7 + $0x8] sm:$0xff]  ;;  %v251_v11 = vld [vmem:[#allocation7] sm:$0xff] }
  0x12   :  { %v265_v12 = vld [vmem:[%s427_s2] ss:$0 sm:$0xff] }
  0x13   :  { %100 = vmatpush.bf16.msra.mxu0 %v249_v2  ;;  %v266_v18 = vld [vmem:[%s429_s4] ss:$0 sm:$0xff] }
  0x14   :  { %177 = vmatpush.bf16.msra.mxu1 %v257_v4 }
  0x16   :  { %216 = vmatmul.msk.bf16.vlgmr.msra.gmra.mxu0 %vm89_vm0, %v68_v5 }
  0x18   :  { %178 = vmatpush.bf16.msra.mxu1 %v256_v6 }
  0x1c   :  { %179 = vmatpush.bf16.msra.mxu1 %v255_v7 }
  0x20   :  { %180 = vmatpush.bf16.msra.mxu1 %v254_v8 }
  0x24   :  { %181 = vmatpush.bf16.msra.mxu1 %v253_v9 }
  0x28   :  { %182 = vmatpush.bf16.msra.mxu1 %v252_v10 }
  0x2c   :  { %183 = vmatpush.bf16.msra.mxu1 %v251_v11 }
  0x93   :  { %v102_v13 = vpop.f32.mrf.mxu0 }
  0x94   :  { %v103_v14 = vadd.f32 %v265_v12, %v102_v13 }
  0x96   :  { %267 = vtanh.f32 %v103_v14 }
  0x9b   :  { %v104_v15 = vpop.f32.mrf.mxu0 }
  0x9c   :  { %v268_v16 = vpop.eup %267 }
  0x9d   :  { %v107_v17 = vpack.c.bf16 %v268_v16, %v268_v16 }
  0x9f   :  { %184 = vmatmul.bf16.vlgmr.msra.gmra.mxu1 %v107_v17 }
 0x11c   :  { %v185_v19 = vpop.f32.mrf.mxu1 }
 0x11d   :  { %v186_v20 = vadd.f32 %v266_v18, %v185_v19 }
 0x11f   :  { %189 = vst [vmem:[#allocation8] sm:$0xff] %v186_v20 }
 0x120   :  { %200 = dma.vmem_to_hbm [thread:$0]  %s196_s12, 128, %s198_s15, [#allocation4]  }
 0x124   :  { %v187_v21 = vpop.f32.mrf.mxu1 }
 0x125   :  { %369 = dma.done.wait [#allocation4], 128  }
 0x126   :  { %370 = vsyncadd [#allocation4], 4294967168 }
 0x127   :  { %205 = vsyncpa [#allocation3], 1 }
 0x128   :  { %206 = vsyncpa [#allocation6], 1 }
 0x129   :  { %207 = vsyncpa [#allocation4], 1 }

</bundles_post_ra>
